<compile_context>
chip_gen: v6e
topology: v6e:2x2x1
jax: 0.10.0
libtpu: 0.0.40
codegen_flags: <defaults>
</compile_context>

<pallas_src>
import jax
import jax.numpy as jnp
from jax.experimental import pallas as pl
from jax.experimental.pallas import tpu as pltpu


def _linear_attention_kernel(w_ref, l_ref, g_ref, c_ref, gout_ref):
    """One grid step: a block of Nb batch elements.

    w_ref    : SMEM (C,)   f32  -- 1x1 conv weight (scalar-prefetched)
    l_ref    : VMEM (Nb, C, S)  -- local features, spatial on the lane axis
    g_ref    : VMEM (Nb, C, S)  -- global features
    c_ref    : VMEM (Nb, 1, S)  -- pre-softmax attention map (lane-dense store)
    gout_ref : VMEM (Nb, C)     -- attention-weighted channel sums
    """
    c_in = l_ref.shape[1]

    # Upcast so the conv reduce, exp and softmax sums accumulate in f32 even
    # if the HBM inputs are bf16.
    l = l_ref[...].astype(jnp.float32)                       # (Nb, C, S)
    x = l + g_ref[...].astype(jnp.float32)                   # (Nb, C, S)

    # 1x1 conv with a single output channel: per-channel SMEM scalar times the
    # (Nb, 1, S) slab, accumulated on the VPU (static C=4 loop, unrolled).
    conv = x[:, 0:1, :] * w_ref[0]                            # (Nb, 1, S) f32
    for ci in range(1, c_in):
        conv = conv + x[:, ci:ci + 1, :] * w_ref[ci]

    # Lane-dense store of the pre-softmax map (this is the `c` output).
    c_ref[...] = conv.astype(c_ref.dtype)

    # Per-row spatial softmax; `a = e / denom` is never materialized — the
    # normalization folds into one exact reciprocal on the (Nb, C) result.
    m = jnp.max(conv, axis=-1, keepdims=True)                 # (Nb, 1, 1)
    e = jnp.exp(conv - m)                                     # (Nb, 1, S) EUP
    denom = jnp.sum(e, axis=-1)                               # (Nb, 1)

    # g_out[n, c] = (sum_s e[n, s] * l[n, c, s]) / denom[n]
    num = jnp.sum(l * e, axis=-1)                             # (Nb, C)
    gout_ref[...] = (num * pl.reciprocal(denom)).astype(gout_ref.dtype)


@jax.jit
def linear_attention_block(l_nchw, g_nchw, weight):
    """Fused LinearAttentionBlock forward.

    l_nchw, g_nchw: (N, C, H, W)
    weight:         (1, C, 1, 1)  -- PyTorch Conv2d(C, 1, 1, bias=False) weight
    returns: (c, g_out) with c: (N, 1, H, W), g_out: (N, C)
    """
    n, c_in, h, w = l_nchw.shape
    s = h * w

    # Coarsened batch tiling: each grid step should move ~0.5-1 MB.  At C=4
    # (padded to 8 sublanes) and S=256 that is Nb ~ 64-128; cap at 128 so the
    # double-buffered per-step footprint (~Nb x 32 KB ~ 4 MB) stays far below
    # v7x's 64 MiB physical / 32 MiB scoped VMEM.  At N=2 the whole batch is a
    # single step (grid=(1,)), eliminating per-step overhead on v5e/v6e.
    nb = min(n, 128)
    grid_n = pl.cdiv(n, nb)

    # Pure reshapes of trailing contiguous dims (no transpose, no extra HBM
    # round trip): spatial becomes the lane axis.
    l3 = l_nchw.reshape(n, c_in, s)
    g3 = g_nchw.reshape(n, c_in, s)
    w_vec = weight.reshape(c_in).astype(jnp.float32)          # (C,) SMEM scalars

    cost = pl.CostEstimate(
        flops=5 * n * c_in * s + 4 * n * s,
        transcendentals=n * s,
        bytes_accessed=4 * (2 * n * c_in * s + n * s + n * c_in + c_in),
    )

    c_out, g_out = pl.pallas_call(
        _linear_attention_kernel,
        out_shape=(
            jax.ShapeDtypeStruct((n, 1, s), l_nchw.dtype),
            jax.ShapeDtypeStruct((n, c_in), l_nchw.dtype),
        ),
        grid_spec=pltpu.PrefetchScalarGridSpec(
            num_scalar_prefetch=1,            # conv weight -> SMEM scalars
            grid=(grid_n,),
            in_specs=[
                # (Nb, C, S): last two dims equal the full array dims (C=4 < 8
                # is legal because it is the full extent); S is a multiple of
                # 128 (lane-dense).  index_maps receive the prefetch ref too.
                pl.BlockSpec((nb, c_in, s), lambda i, w_s: (i, 0, 0)),
                pl.BlockSpec((nb, c_in, s), lambda i, w_s: (i, 0, 0)),
            ],
            out_specs=(
                pl.BlockSpec((nb, 1, s), lambda i, w_s: (i, 0, 0)),
                pl.BlockSpec((nb, c_in), lambda i, w_s: (i, 0)),
            ),
        ),
        compiler_params=pltpu.CompilerParams(
            # Batch axis is independent: lets v7x shard steps across its two
            # TensorCores when grid_n >= 2; harmless at grid_n == 1.
            dimension_semantics=("parallel",),
            vmem_limit_bytes=32 * 1024 * 1024,
        ),
        cost_estimate=cost,
    )(w_vec, l3, g3)

    return c_out.reshape(n, 1, h, w), g_out


if __name__ == "__main__":
    # Small shapes consistent with the module: batch=2, channels=4, 16x16.
    N, C, H, W = 2, 4, 16, 16

    key = jax.random.PRNGKey(0)
    kl, kg, kw = jax.random.split(key, 3)
    l = jax.random.normal(kl, (N, C, H, W), dtype=jnp.float32)
    g = jax.random.normal(kg, (N, C, H, W), dtype=jnp.float32)
    # Deterministic Conv2d weight, PyTorch layout (Cout=1, Cin=C, 1, 1).
    weight = 0.05 * jax.random.normal(kw, (1, C, 1, 1), dtype=jnp.float32)

    c_out, g_out = linear_attention_block(l, g, weight)
    c_out, g_out = jax.block_until_ready((c_out, g_out))

    # Pure-JAX reference matching the PyTorch forward.
    x = l + g
    wv = weight.reshape(C)
    c_ref = jnp.einsum("nchw,c->nhw", x, wv)[:, None, :, :]               # (N,1,H,W)
    a_ref = jax.nn.softmax(c_ref.reshape(N, 1, -1), axis=2).reshape(N, 1, H, W)
    g_ref = jnp.sum(a_ref * l, axis=(2, 3))                               # (N,C)

    assert c_out.shape == (N, 1, H, W), c_out.shape
    assert g_out.shape == (N, C), g_out.shape
    assert jnp.allclose(c_out, c_ref, atol=1e-5, rtol=1e-4)
    assert jnp.allclose(g_out, g_ref, atol=1e-5, rtol=1e-4)

    print("KERNEL_OK")
</pallas_src>

<mosaic_0001>
module attributes {stable_mosaic.version = 11 : i64} {
  func.func @_linear_attention_kernel(%arg0: i32, %arg1: memref<4xf32, #tpu.memory_space<smem>>, %arg2: memref<2x4x256xf32, #tpu.memory_space<vmem>>, %arg3: memref<2x4x256xf32, #tpu.memory_space<vmem>>, %arg4: memref<2x1x256xf32, #tpu.memory_space<vmem>>, %arg5: memref<2x4xf32, #tpu.memory_space<vmem>>) attributes {dimension_semantics = [#tpu.dimension_semantics<parallel>], iteration_bounds = array<i64: 1>, scalar_prefetch = 1 : i64, scratch_operands = 0 : i64, tpu.core_type = #tpu.core_type<tc>, window_params = [{transform_indices = @transform_0, window_bounds = array<i64: 2, 4, 256>}, {transform_indices = @transform_1, window_bounds = array<i64: 2, 4, 256>}, {transform_indices = @transform_2, window_bounds = array<i64: 2, 1, 256>}, {transform_indices = @transform_3, window_bounds = array<i64: 2, 4>}]} {
    %c0 = arith.constant 0 : index
    %c0_0 = arith.constant 0 : index
    %c0_1 = arith.constant 0 : index
    %0 = vector.load %arg2[%c0, %c0_0, %c0_1] : memref<2x4x256xf32, #tpu.memory_space<vmem>>, vector<2x4x256xf32>
    %c0_2 = arith.constant 0 : index
    %c0_3 = arith.constant 0 : index
    %c0_4 = arith.constant 0 : index
    %1 = vector.load %arg3[%c0_2, %c0_3, %c0_4] : memref<2x4x256xf32, #tpu.memory_space<vmem>>, vector<2x4x256xf32>
    %2 = arith.addf %0, %1 : vector<2x4x256xf32>
    %3 = vector.extract_strided_slice %2 {offsets = [0, 0, 0], sizes = [2, 1, 256], strides = [1, 1, 1]} : vector<2x4x256xf32> to vector<2x1x256xf32>
    %c0_5 = arith.constant 0 : index
    %4 = memref.load %arg1[%c0_5] : memref<4xf32, #tpu.memory_space<smem>>
    %5 = vector.broadcast %4 : f32 to vector<2x1x256xf32>
    %6 = arith.mulf %3, %5 : vector<2x1x256xf32>
    %7 = vector.extract_strided_slice %2 {offsets = [0, 1, 0], sizes = [2, 1, 256], strides = [1, 1, 1]} : vector<2x4x256xf32> to vector<2x1x256xf32>
    %c1 = arith.constant 1 : index
    %8 = memref.load %arg1[%c1] : memref<4xf32, #tpu.memory_space<smem>>
    %9 = vector.broadcast %8 : f32 to vector<2x1x256xf32>
    %10 = arith.mulf %7, %9 : vector<2x1x256xf32>
    %11 = arith.addf %6, %10 : vector<2x1x256xf32>
    %12 = vector.extract_strided_slice %2 {offsets = [0, 2, 0], sizes = [2, 1, 256], strides = [1, 1, 1]} : vector<2x4x256xf32> to vector<2x1x256xf32>
    %c2 = arith.constant 2 : index
    %13 = memref.load %arg1[%c2] : memref<4xf32, #tpu.memory_space<smem>>
    %14 = vector.broadcast %13 : f32 to vector<2x1x256xf32>
    %15 = arith.mulf %12, %14 : vector<2x1x256xf32>
    %16 = arith.addf %11, %15 : vector<2x1x256xf32>
    %17 = vector.extract_strided_slice %2 {offsets = [0, 3, 0], sizes = [2, 1, 256], strides = [1, 1, 1]} : vector<2x4x256xf32> to vector<2x1x256xf32>
    %c3 = arith.constant 3 : index
    %18 = memref.load %arg1[%c3] : memref<4xf32, #tpu.memory_space<smem>>
    %19 = vector.broadcast %18 : f32 to vector<2x1x256xf32>
    %20 = arith.mulf %17, %19 : vector<2x1x256xf32>
    %21 = arith.addf %16, %20 : vector<2x1x256xf32>
    %c0_6 = arith.constant 0 : index
    %c0_7 = arith.constant 0 : index
    %c0_8 = arith.constant 0 : index
    %22 = vector.load %arg4[%c0_6, %c0_7, %c0_8] : memref<2x1x256xf32, #tpu.memory_space<vmem>>, vector<2x1x256xf32>
    tpu.vector_store %arg4[%c0_6, %c0_7, %c0_8], %21 {strides = array<i32>} : memref<2x1x256xf32, #tpu.memory_space<vmem>>, vector<2x1x256xf32>,
    %cst = arith.constant dense<0xFF800000> : vector<2x1xf32>
    %23 = vector.multi_reduction <maximumf>, %21, %cst [2] : vector<2x1x256xf32> to vector<2x1xf32>
    %24 = vector.shape_cast %23 : vector<2x1xf32> to vector<2x1x1xf32>
    %25 = vector.broadcast %24 : vector<2x1x1xf32> to vector<2x1x256xf32>
    %26 = arith.subf %21, %25 : vector<2x1x256xf32>
    %27 = math.exp %26 : vector<2x1x256xf32>
    %cst_9 = arith.constant dense<0.000000e+00> : vector<2x1xf32>
    %28 = vector.multi_reduction <add>, %27, %cst_9 [2] : vector<2x1x256xf32> to vector<2x1xf32>
    %29 = vector.broadcast %27 : vector<2x1x256xf32> to vector<2x4x256xf32>
    %30 = arith.mulf %0, %29 : vector<2x4x256xf32>
    %cst_10 = arith.constant dense<0.000000e+00> : vector<2x4xf32>
    %31 = vector.multi_reduction <add>, %30, %cst_10 [2] : vector<2x4x256xf32> to vector<2x4xf32>
    %32 = tpu.reciprocal %28 : vector<2x1xf32> -> vector<2x1xf32>
    %33 = vector.broadcast %32 : vector<2x1xf32> to vector<2x4xf32>
    %34 = arith.mulf %31, %33 : vector<2x4xf32>
    %c0_11 = arith.constant 0 : index
    %c0_12 = arith.constant 0 : index
    %35 = vector.load %arg5[%c0_11, %c0_12] : memref<2x4xf32, #tpu.memory_space<vmem>>, vector<2x4xf32>
    tpu.vector_store %arg5[%c0_11, %c0_12], %34 {strides = array<i32>} : memref<2x4xf32, #tpu.memory_space<vmem>>, vector<2x4xf32>,
    return
  }
  func.func @transform_0(%arg0: i32, %arg1: memref<4xf32, #tpu.memory_space<smem>>) -> (i32, i32, i32) {
    %c0_i32 = arith.constant 0 : i32
    %c0_i32_0 = arith.constant 0 : i32
    %c0_i32_1 = arith.constant 0 : i32
    return %arg0, %c0_i32, %c0_i32_0 : i32, i32, i32
  }
  func.func @transform_1(%arg0: i32, %arg1: memref<4xf32, #tpu.memory_space<smem>>) -> (i32, i32, i32) {
    %c0_i32 = arith.constant 0 : i32
    %c0_i32_0 = arith.constant 0 : i32
    %c0_i32_1 = arith.constant 0 : i32
    return %arg0, %c0_i32, %c0_i32_0 : i32, i32, i32
  }
  func.func @transform_2(%arg0: i32, %arg1: memref<4xf32, #tpu.memory_space<smem>>) -> (i32, i32, i32) {
    %c0_i32 = arith.constant 0 : i32
    %c0_i32_0 = arith.constant 0 : i32
    %c0_i32_1 = arith.constant 0 : i32
    return %arg0, %c0_i32, %c0_i32_0 : i32, i32, i32
  }
  func.func @transform_3(%arg0: i32, %arg1: memref<4xf32, #tpu.memory_space<smem>>) -> (i32, i32) {
    %c0_i32 = arith.constant 0 : i32
    %c0_i32_0 = arith.constant 0 : i32
    return %arg0, %c0_i32 : i32, i32
  }
}

</mosaic_0001>

<bundles_post_ra>
// kernel: linear_attention_block.1
= control target key start
LH: loop header
LB: loop body
LE: loop exit
PB: predicated region body
PF: predicated region fallthrough
CT: control target
= control target key end

     0   :  { %s436_s0 = inlined_call_operand.vmem [shape: f32[4], index: 0, kind: input, shape index: {}]   ;;  %s437_s1 = inlined_call_operand.vmem [shape: f32[2,4,256], index: 1, kind: input, shape index: {}]   ;;  %s438_s2 = inlined_call_operand.vmem [shape: f32[2,4,256], index: 2, kind: input, shape index: {}]   ;;  %s439_s3 = inlined_call_operand.vmem [shape: f32[2,1,256], index: 3, kind: output, shape index: {0}]   ;;  %s440_s4 = inlined_call_operand.hbm [shape: f32[2,4], index: 4, kind: output, shape index: {1}]  }
   0x1   :  { %s10_s17 = sshll.u32 %s436_s0, 4  ;;  %s11_s17 = int_to_ptr.vmem [resolvable:$true] %s10_s17 }
   0x2   :  { %s309_s18 = scalar_lea.vmem %s11_s17, 16  ;;  %p314_p1 = scmp.lt.s32.totalorder %s11_s17, %s11_s17 }
   0x3   :  { %p310_p0 = scmp.ne.s32.totalorder %s11_s17, %s309_s18  ;;  %p315_p2 = scmp.lt.s32.totalorder %s309_s18, %s309_s18 }
   0x5   :  { %p316_p3 = por %p315_p2, %p314_p1 }
   0x7   :  { %p317_p4 = pnand %p316_p3, %p310_p0 }
   0x9   :  { %320 = shalt.err (!%p317_p4)  }
   0xa   :  { %s345_s19 = smov [#allocation3]  }
   0xb   :  { %13 = dma.vmem_to_smem %s11_s17, 16, %s345_s19, [#allocation2] }
   0xc   :  { %341 = dma.done.wait [#allocation2], 16 }
   0xd   :  { %342 = vsyncadd [#allocation2], 4294967280 }
   0xe   :  { %15 = sfence }
   0xf   :  { %v380_v0 = vld [vmem:[%s437_s1] sm:$0xff]  ;;  %s27_s22 = sld [smem:[#allocation3]]  ;;  %v388_v2 = vld [vmem:[%s437_s1 + $0x8] sm:$0xff]  ;;  %v78_v4 = vlaneseq }
  0x10   :  { %v23_v1 = vld [vmem:[%s438_s2] sm:$0xff]  ;;  %s288_s24 = sld [smem:[#allocation3 + $0x1]]  ;;  %v24_v3 = vld [vmem:[%s438_s2 + $0x8] sm:$0xff] }
  0x11   :  { %s291_s29 = sld [smem:[#allocation3 + $0x2]] }
  0x12   :  { %s294_s30 = sld [smem:[#allocation3 + $0x3]] }
  0x13   :  { %16 = vsyncpa [#allocation5], 0  ;;  %v25_v5 = vadd.f32 %v23_v1, %v380_v0  ;;  %v26_v6 = vadd.f32 %v24_v3, %v388_v2  ;;  %v346_v7 = vmov 1966171168   ;;  %v396_v12 = vshrl.u32 %v78_v4, 7 }
  0x14   :  { %v76_v8 = vunpack.c.l.s4 %v346_v7  ;;  %vm131_vm0 = vcmask 1040384   ;;  %vm107_vm1 = vcmp.lt.s32.totalorder %v78_v4, 256  ;;  %v347_v52 = vmov 839922192  }
  0x15   :  { %v28_v9 = vstv %s27_s22  ;;  %v399_v31 = vsub.s32 0, %v396_v12  ;;  %v117_v34 = vsub.s32 4, %v396_v12  ;;  %v145_v53 = vunpack.c.l.s4 %v347_v52 }
  0x16   :  { %v29_v10 = vmul.f32 %v28_v9, %v25_v5  ;;  %v32_v11 = vstv %s288_s24  ;;  %v30_v15 = vmul.f32 %v28_v9, %v26_v6  ;;  %v77_v19 = vunpack.c.0.s8 %v76_v8 }
  0x17   :  { %v33_v13 = vmul.f32 %v32_v11, %v25_v5  ;;  %v46_v14 = vstv %s291_s29  ;;  %v34_v16 = vmul.f32 %v32_v11, %v26_v6  ;;  %v146_v54 = vunpack.c.0.s8 %v145_v53 }
  0x18   :  { %v47_v17 = vmul.f32 %v46_v14, %v25_v5  ;;  %v60_v18 = vstv %s294_s30  ;;  %v48_v20 = vmul.f32 %v46_v14, %v26_v6  ;;  %v80_v33 = vsub.s32 %v77_v19, %v396_v12 }
  0x19   :  { %v289_v21 = vrot.slane %v33_v13, 9  ;;  %v61_v22 = vmul.f32 %v60_v18, %v25_v5  ;;  %v290_v23 = vrot.slane %v34_v16, 9  ;;  %v62_v24 = vmul.f32 %v60_v18, %v26_v6 }
  0x1a   :  { %v292_v25 = vrot.slane %v47_v17, 10  ;;  %v293_v26 = vrot.slane %v48_v20, 10  ;;  %v149_v55 = vsub.s32 %v146_v54, %v396_v12  ;;  %vm230_vm2 = vcmask 1043456  }
  0x1b   :  { %v43_v27 = vadd.f32 %v289_v21, %v29_v10  ;;  %v295_v28 = vrot.slane %v61_v22, 11  ;;  %v44_v29 = vadd.f32 %v290_v23, %v30_v15  ;;  %v296_v30 = vrot.slane %v62_v24, 11 }
  0x1c   :  { %vm265_vm3 = vcmask 1041409   ;;  %vm268_vm4 = vcmask 25600  }
  0x1d   :  { %v57_v32 = vadd.f32 %v292_v25, %v43_v27  ;;  %v58_v35 = vadd.f32 %v293_v26, %v44_v29 }
  0x1f   :  { %v71_v36 = vadd.f32 %v295_v28, %v57_v32  ;;  %v72_v37 = vadd.f32 %v296_v30, %v58_v35 }
  0x21   :  { %v114_v38 = vrot.slane %v71_v36, %v399_v31  ;;  %v118_v39 = vrot.slane %v71_v36, %v117_v34  ;;  %v81_v40 = vrot.slane %v71_v36, %v80_v33  ;;  %v95_v41 = vrot.slane %v72_v37, %v80_v33 }
  0x22   :  { %v122_v42 = vrot.slane %v72_v37, %v399_v31  ;;  %v126_v43 = vrot.slane %v72_v37, %v117_v34 }
  0x23   :  { %v132_v44 = vsel %vm131_vm0, %v114_v38, -inf  ;;  %v133_v45 = vsel %vm131_vm0, %v118_v39, -inf  ;;  %v88_v46 = vrot.slane %v81_v40, %v80_v33  ;;  %v102_v47 = vrot.slane %v95_v41, %v80_v33 }
  0x24   :  { %v134_v48 = vmax.f32 %v132_v44, %v133_v45  ;;  %v137_v49 = vsel %vm131_vm0, %v122_v42, -inf  ;;  %v138_v50 = vsel %vm131_vm0, %v126_v43, -inf }
  0x25   :  { %109 = vst.msk [vmem:[%s439_s3] sm:$0x3] %vm107_vm1, %v88_v46  ;;  %110 = vst.msk [vmem:[%s439_s3 + $0x2] sm:$0x3] %vm107_vm1, %v102_v47  ;;  %v139_v51 = vmax.f32 %v137_v49, %v138_v50  ;;  %s348_s3 = smov [#allocation4]  }
  0x26   :  { %135 = vmax.xlane.f32.xlu0 %v134_v48  ;;  %s278_s7 = sshll.u32 %s348_s3, 4  ;;  %s279_s7 = int_to_ptr.vmem [resolvable:$true] %s278_s7 }
  0x27   :  { %s321_s8 = scalar_lea.vmem %s279_s7, 32  ;;  %p326_p6 = scmp.lt.s32.totalorder %s279_s7, %s279_s7 }
  0x28   :  { %p322_p5 = scmp.ne.s32.totalorder %s279_s7, %s321_s8  ;;  %p327_p7 = scmp.lt.s32.totalorder %s321_s8, %s321_s8 }
  0x2a   :  { %140 = vmax.xlane.f32.xlu0 %v139_v51  ;;  %p328_p8 = por %p327_p7, %p326_p6 }
  0x2c   :  { %p329_p9 = pnand %p328_p8, %p322_p5 }
  0xaf   :  { %v136_v56 = vpop.xlane.xlu0 %135 }
  0xb0   :  { %v150_v57 = vrot.slane %v136_v56, %v149_v55 }
  0xb2   :  { %v160_v58 = vsub.f32 %v71_v36, %v150_v57  ;;  %v256_v36 = vand.u32 127, %v78_v4 }
  0xb3   :  { %v141_v59 = vpop.xlane.xlu0 %140 }
  0xb4   :  { %v162_v60 = vmul.f32 1.442695, %v160_v58  ;;  %v157_v61 = vrot.slane %v141_v59, %v149_v55  ;;  %v259_v38 = vsub.s32 %v256_v36, %v396_v12 }
  0xb6   :  { %301 = vpow2.f32 %v162_v60  ;;  %v161_v62 = vsub.f32 %v72_v37, %v157_v61 }
  0xb8   :  { %v164_v63 = vmul.f32 1.442695, %v161_v62 }
  0xba   :  { %303 = vpow2.f32 %v164_v63 }
  0xc3   :  { %v302_v1 = vpop.eup %301 }
  0xc4   :  { %v171_v3 = vrot.slane %v302_v1, %v399_v31  ;;  %v175_v5 = vrot.slane %v302_v1, %v117_v34 }
  0xc6   :  { %v188_v6 = vsel %vm131_vm0, %v171_v3, 0.0  ;;  %v189_v7 = vsel %vm131_vm0, %v175_v5, 0.0  ;;  %v201_v8 = vrot.slane %v171_v3, %v399_v31  ;;  %v205_v9 = vrot.slane %v175_v5, %v399_v31 }
  0xc7   :  { %v304_v10 = vpop.eup %303  ;;  %v190_v11 = vadd.f32 %v189_v7, %v188_v6 }
  0xc8   :  { %v179_v13 = vrot.slane %v304_v10, %v399_v31  ;;  %v183_v14 = vrot.slane %v304_v10, %v117_v34  ;;  %v218_v15 = vcombine.low %v201_v8, %v205_v9 }
  0xc9   :  { %191 = vadd.xlane.f32.xlu1 %v190_v11 }
  0xca   :  { %v193_v16 = vsel %vm131_vm0, %v179_v13, 0.0  ;;  %v194_v17 = vsel %vm131_vm0, %v183_v14, 0.0  ;;  %v209_v18 = vrot.slane %v179_v13, %v399_v31  ;;  %v213_v19 = vrot.slane %v183_v14, %v399_v31 }
  0xcb   :  { %v195_v20 = vadd.f32 %v194_v17, %v193_v16  ;;  %v222_v21 = vmul.f32 %v218_v15, %v380_v0 }
  0xcc   :  { %v219_v22 = vcombine.low %v209_v18, %v213_v19 }
  0xcd   :  { %196 = vadd.xlane.f32.xlu1 %v195_v20  ;;  %v226_v23 = vcombine.high %v222_v21, %v222_v21  ;;  %v231_v25 = vsel %vm230_vm2, %v222_v21, 0.0 }
  0xce   :  { %v223_v24 = vmul.f32 %v219_v22, %v388_v2 }
  0xcf   :  { %v232_v26 = vsel %vm230_vm2, %v226_v23, 0.0 }
  0xd0   :  { %v233_v27 = vadd.f32 %v232_v26, %v231_v25  ;;  %v227_v28 = vcombine.high %v223_v24, %v223_v24  ;;  %v236_v29 = vsel %vm230_vm2, %v223_v24, 0.0 }
  0xd2   :  { %234 = vadd.xlane.f32.xlu0 %v233_v27  ;;  %v237_v30 = vsel %vm230_vm2, %v227_v28, 0.0 }
  0xd3   :  { %v238_v32 = vadd.f32 %v237_v30, %v236_v29 }
  0xd5   :  { %239 = vadd.xlane.f32.xlu1 %v238_v32 }
 0x152   :  { %v192_v33 = vpop.xlane.xlu1 %191 }
 0x153   :  { %305 = vrcp.f32 %v192_v33 }
 0x156   :  { %v197_v34 = vpop.xlane.xlu1 %196 }
 0x157   :  { %307 = vrcp.f32 %v197_v34 }
 0x15b   :  { %v235_v2 = vpop.xlane.xlu0 %234 }
 0x15e   :  { %v240_v41 = vpop.xlane.xlu1 %239 }
 0x160   :  { %v306_v0 = vpop.eup %305 }
 0x161   :  { %v246_v35 = vrot.slane %v306_v0, %v399_v31 }
 0x163   :  { %v251_v39 = vmul.f32 %v246_v35, %v235_v2 }
 0x164   :  { %v308_v37 = vpop.eup %307 }
 0x165   :  { %v250_v40 = vrot.slane %v308_v37, %v399_v31  ;;  %v260_v43 = vrot.slane %v251_v39, %v259_v38 }
 0x167   :  { %v252_v42 = vmul.f32 %v250_v40, %v240_v41 }
 0x169   :  { %v264_v44 = vrot.slane %v252_v42, %v259_v38 }
 0x16b   :  { %v266_v45 = vsel %vm265_vm3, %v264_v44, %v260_v43 }
 0x16c   :  { %269 = vst.msk [vmem:[#allocation4] sm:$0x3] %vm268_vm4, %v266_v45 }
 0x16d   :  { %332 = shalt.err (!%p329_p9)
}
 0x16e   :  { %281 = dma.vmem_to_hbm [thread:$0]  %s279_s7, 32, %s440_s4, [#allocation5]  }
 0x16f   :  { %343 = dma.done.wait [#allocation5], 32  }
 0x170   :  { %344 = vsyncadd [#allocation5], 4294967264 }
 0x171   :  { %287 = vsyncpa [#allocation5], 1 }

</bundles_post_ra>
